<compile_context>
chip_gen: v5e
topology: v5e:2x2
jax: 0.10.0
libtpu: 0.0.40
codegen_flags: <defaults>
</compile_context>

<pallas_src>
import jax
import jax.numpy as jnp
from jax.experimental import pallas as pl
from jax.experimental.pallas import tpu as pltpu

# Static tokenizer config (the tokenizer object itself is untranslatable; its special
# ids are compile-time constants consumed in the wrapper-side mask).
UNK_ID, CLS_ID, EOS_ID = 1, 2, 3


def _online_lse_kernel(h_ref, w_ref, lse_ref, m_s, s_s):
    """Grid = (batch_tiles, vocab_splits, vocab_steps).  Streams (v_tile, E) weight
    blocks and carries a running (max, sum-exp) per row in VMEM scratch."""
    k = pl.program_id(2)

    @pl.when(k == 0)
    def _init():
        m_s[...] = jnp.full_like(m_s, -jnp.inf)
        s_s[...] = jnp.zeros_like(s_s)

    # logits tile: (b_tile, v_tile) = h @ W_tile.T, f32 accumulation on the MXU.
    # (trans_b contraction — no in-kernel transpose of the weight tile.)
    logits = jax.lax.dot_general(
        h_ref[...], w_ref[...],
        dimension_numbers=(((1,), (1,)), ((), ())),
        preferred_element_type=jnp.float32)

    # Online logsumexp update over the vocab axis.
    m_prev = m_s[...]
    m_new = jnp.maximum(m_prev, jnp.max(logits, axis=-1, keepdims=True))
    s_s[...] = (s_s[...] * jnp.exp(m_prev - m_new)
                + jnp.sum(jnp.exp(logits - m_new), axis=-1, keepdims=True))
    m_s[...] = m_new

    # Finalize this split's partial LSE (combined across splits in the wrapper).
    @pl.when(k == pl.num_programs(2) - 1)
    def _finalize():
        lse_ref[...] = (m_s[...] + jnp.log(s_s[...])).reshape(lse_ref.shape)


def _default_vmem_limit():
    """Generation-aware scoped-VMEM limit: ~70% of physical, capped at 100 MiB.
    (128 MiB on v5e/v6e -> ~90 MiB; 64 MiB on v7x -> ~45 MiB.)"""
    cap = 128 * 1024 * 1024
    try:
        cap = int(getattr(pltpu.get_tpu_info(), "vmem_capacity_bytes", cap))
    except Exception:
        pass
    return int(min(cap * 0.70, 100 * 1024 * 1024))


def _pick_v_tile(V, cap):
    """Largest lane/MXU-friendly divisor of V that fits the VMEM row budget `cap`.
    Prefers multiples of 512/256 (256x256 MXU on v6e/v7x), then 128, then 8."""
    cap = int(min(max(cap, 8), V))
    for align in (512, 256, 128, 8):
        c = (cap // align) * align
        while c >= align:
            if V % c == 0:
                return c
            c -= align
    return V  # fallback: single tile (V must then fit the VMEM budget)


def bow_loss(outs, w_proj, b_proj, w_out, label, attention_mask,
             unk_id=UNK_ID, cls_id=CLS_ID, eos_id=EOS_ID,
             weights_dtype=None, v_tile=None, b_tile=None,
             num_vocab_splits=None, vmem_limit_bytes=None):
    """outs: (B, E); w_proj: (E, E) torch layout (out, in); b_proj: (E,);
    w_out (tied embed): (V, E); label: (B, L) int; attention_mask: (B, L) {0,1}.
    weights_dtype=jnp.bfloat16 halves weight-streaming HBM bytes (looser accuracy).
    Returns scalar f32 loss."""
    B, E = outs.shape
    V, E2 = w_out.shape
    assert E == E2

    # ---- streaming dtype for the tied embedding (bf16 halves HBM weight traffic) ----
    w_stream = w_out if weights_dtype is None else w_out.astype(weights_dtype)
    wbytes = jnp.dtype(w_stream.dtype).itemsize

    # ---- h = proj(outs): tiny (B,E)x(E,E) matmul, hoisted to XLA (perf opt 3) ----
    h32 = (outs.astype(jnp.float32) @ w_proj.astype(jnp.float32).T
           + b_proj.astype(jnp.float32))
    h = h32.astype(w_stream.dtype)          # kernel input already in streaming dtype

    # ---- gathered-logit term + valid-token count, O(B*L*E) in the wrapper (opt 1) ----
    label = label.astype(jnp.int32)
    valid = ~((label == unk_id) | (label == cls_id) | (label == eos_id)
              | (attention_mask.astype(jnp.int32) == 0))
    n_valid = jnp.sum(valid, axis=-1).astype(jnp.float32)                   # (B,)
    emb = jnp.take(w_stream, label, axis=0).astype(jnp.float32)             # (B, L, E)
    tok_logits = jnp.einsum('be,ble->bl', h.astype(jnp.float32), emb)       # (B, L)
    g = jnp.sum(jnp.where(valid, tok_logits, 0.0), axis=-1)                 # (B,)

    # ---- generation-aware VMEM budget & tile sizing ----
    if vmem_limit_bytes is None:
        vmem_limit_bytes = _default_vmem_limit()
    if b_tile is None:
        b_tile = B                           # stream the weight exactly once (opt 2)
    assert B % b_tile == 0 and (b_tile == B or b_tile % 8 == 0)

    if v_tile is None:
        budget = int(0.75 * vmem_limit_bytes)
        fixed = 2 * b_tile * E * wbytes                 # double-buffered h block
        per_row = 2 * E * wbytes + 3 * b_tile * 4       # w double-buffer + f32 temps
        v_tile = _pick_v_tile(V, (budget - fixed) // per_row)
    assert V % v_tile == 0, "vocab size must be divisible by v_tile (pad w_out if not)"

    n_tiles = V // v_tile
    if num_vocab_splits is None:
        # Split the vocab axis (not the batch) across TensorCores: both v7x TCs work
        # without re-streaming the weight; harmless (sequential) on single-TC chips.
        num_vocab_splits = 2 if (n_tiles >= 2 and n_tiles % 2 == 0) else 1
    assert n_tiles % num_vocab_splits == 0
    kpers = n_tiles // num_vocab_splits
    S = num_vocab_splits

    grid = (B // b_tile, S, kpers)

    lse_parts = pl.pallas_call(
        _online_lse_kernel,
        out_shape=jax.ShapeDtypeStruct((S, B, 1), jnp.float32),
        grid_spec=pltpu.PrefetchScalarGridSpec(
            num_scalar_prefetch=0,
            grid=grid,
            in_specs=[
                pl.BlockSpec((b_tile, E), lambda i, c, k: (i, 0)),              # h
                pl.BlockSpec((v_tile, E), lambda i, c, k: (c * kpers + k, 0)),  # W tile
            ],
            out_specs=pl.BlockSpec((1, b_tile, 1), lambda i, c, k: (c, i, 0)),
            scratch_shapes=[
                pltpu.VMEM((b_tile, 1), jnp.float32),   # running max
                pltpu.VMEM((b_tile, 1), jnp.float32),   # running sum-exp
            ]),
        compiler_params=pltpu.CompilerParams(
            dimension_semantics=("parallel", "parallel", "arbitrary"),
            vmem_limit_bytes=int(vmem_limit_bytes)),
    )(h, w_stream)

    # Combine per-split partial LSEs, then assemble the loss:
    #   loss_b = n_valid_b * lse_b - sum_{valid l} logit[b, label[b, l]]
    lse = jax.nn.logsumexp(lse_parts[:, :, 0], axis=0)                       # (B,)
    per_example = n_valid * lse - g
    return jnp.sum(per_example) / B


def bow_loss_reference(outs, w_proj, b_proj, w_out, label, attention_mask):
    h = outs @ w_proj.T + b_proj
    logits = h @ w_out.T
    lprobs = jax.nn.log_softmax(logits, axis=-1)
    gathered = jnp.take_along_axis(-lprobs, label, axis=-1)
    mask = ((label == UNK_ID) | (label == CLS_ID) | (label == EOS_ID)
            | (attention_mask == 0))
    gathered = jnp.where(mask, 0.0, gathered)
    return gathered.sum(axis=-1).mean()


if __name__ == "__main__":
    B, L, E, V = 8, 16, 128, 512

    key = jax.random.PRNGKey(0)
    k_embed, k_proj, k_outs, k_lab, k_mask = jax.random.split(key, 5)

    # Deterministic parameter init (mirrors reset_parameters / tied embedding).
    w_out = jax.random.normal(k_embed, (V, E), dtype=jnp.float32)         # tgt_embed.weight (V, E)
    w_proj = 0.02 * jax.random.normal(k_proj, (E, E), dtype=jnp.float32)  # proj.weight
    b_proj = jnp.zeros((E,), dtype=jnp.float32)                           # proj.bias

    # Inputs.
    outs = jax.random.normal(k_outs, (B, E), dtype=jnp.float32)
    label = jax.random.randint(k_lab, (B, L), 0, V, dtype=jnp.int32)
    attention_mask = (jax.random.uniform(k_mask, (B, L)) > 0.2).astype(jnp.int32)

    ref = bow_loss_reference(outs, w_proj, b_proj, w_out, label, attention_mask)

    # 1) f32 weights, v_tile=128 -> 4 vocab tiles split 2-way: exercises the
    #    online-LSE + per-split partial combine path.
    loss = jax.block_until_ready(
        bow_loss(outs, w_proj, b_proj, w_out, label, attention_mask, v_tile=128))
    assert jnp.allclose(loss, ref, rtol=1e-3, atol=1e-3), (loss, ref)

    # 2) f32 weights, fully automatic (VMEM-budget-driven) tile sizing.
    loss2 = jax.block_until_ready(
        bow_loss(outs, w_proj, b_proj, w_out, label, attention_mask))
    assert jnp.allclose(loss2, ref, rtol=1e-3, atol=1e-3), (loss2, ref)

    # 3) bf16-streamed weights (halves weight HBM traffic); looser tolerance by design.
    loss3 = jax.block_until_ready(
        bow_loss(outs, w_proj, b_proj, w_out, label, attention_mask,
                 weights_dtype=jnp.bfloat16, v_tile=128))
    assert jnp.allclose(loss3, ref, rtol=5e-2, atol=1.0), (loss3, ref)

    print("KERNEL_OK")
</pallas_src>

<mosaic_0001>
module attributes {stable_mosaic.version = 11 : i64} {
  func.func @_online_lse_kernel(%arg0: i32, %arg1: i32, %arg2: i32, %arg3: memref<8x128xf32, #tpu.memory_space<vmem>>, %arg4: memref<128x128xf32, #tpu.memory_space<vmem>>, %arg5: memref<1x8x1xf32, #tpu.memory_space<vmem>>, %arg6: memref<8x1xf32, #tpu.memory_space<vmem>>, %arg7: memref<8x1xf32, #tpu.memory_space<vmem>>) attributes {dimension_semantics = [#tpu.dimension_semantics<parallel>, #tpu.dimension_semantics<parallel>, #tpu.dimension_semantics<arbitrary>], iteration_bounds = array<i64: 1, 2, 2>, scalar_prefetch = 0 : i64, scratch_operands = 2 : i64, tpu.core_type = #tpu.core_type<tc>, window_params = [{transform_indices = @transform_0, window_bounds = array<i64: 8, 128>}, {transform_indices = @transform_1, window_bounds = array<i64: 128, 128>}, {transform_indices = @transform_2, window_bounds = array<i64: 1, 8, 1>}]} {
    %c0_i32 = arith.constant 0 : i32
    %0 = arith.cmpi eq, %arg2, %c0_i32 : i32
    %1 = arith.extui %0 : i1 to i32
    %c0_i32_0 = arith.constant 0 : i32
    %2 = arith.cmpi ne, %1, %c0_i32_0 : i32
    scf.if %2 {
      %cst_15 = arith.constant 0xFF800000 : f32
      %25 = vector.broadcast %cst_15 : f32 to vector<8x1xf32>
      %c0_16 = arith.constant 0 : index
      %c0_17 = arith.constant 0 : index
      %26 = vector.load %arg6[%c0_16, %c0_17] : memref<8x1xf32, #tpu.memory_space<vmem>>, vector<8x1xf32>
      tpu.vector_store %arg6[%c0_16, %c0_17], %25 {strides = array<i32>} : memref<8x1xf32, #tpu.memory_space<vmem>>, vector<8x1xf32>,
      %cst_18 = arith.constant 0.000000e+00 : f32
      %27 = vector.broadcast %cst_18 : f32 to vector<8x1xf32>
      %c0_19 = arith.constant 0 : index
      %c0_20 = arith.constant 0 : index
      %28 = vector.load %arg7[%c0_19, %c0_20] : memref<8x1xf32, #tpu.memory_space<vmem>>, vector<8x1xf32>
      tpu.vector_store %arg7[%c0_19, %c0_20], %27 {strides = array<i32>} : memref<8x1xf32, #tpu.memory_space<vmem>>, vector<8x1xf32>,
    } else {
    }
    %c0 = arith.constant 0 : index
    %c0_1 = arith.constant 0 : index
    %3 = vector.load %arg3[%c0, %c0_1] : memref<8x128xf32, #tpu.memory_space<vmem>>, vector<8x128xf32>
    %c0_2 = arith.constant 0 : index
    %c0_3 = arith.constant 0 : index
    %4 = vector.load %arg4[%c0_2, %c0_3] : memref<128x128xf32, #tpu.memory_space<vmem>>, vector<128x128xf32>
    %cst = arith.constant dense<0.000000e+00> : vector<8x128xf32>
    %5 = tpu.matmul %3, %4, %cst {dimension_numbers = #tpu.dot_dimension_numbers<[1], [1], [0], [0], [0, 0, 1, 0], [], []>} : vector<8x128xf32>, vector<128x128xf32>, vector<8x128xf32> -> vector<8x128xf32>
    %c0_4 = arith.constant 0 : index
    %c0_5 = arith.constant 0 : index
    %6 = vector.load %arg6[%c0_4, %c0_5] : memref<8x1xf32, #tpu.memory_space<vmem>>, vector<8x1xf32>
    %cst_6 = arith.constant dense<0xFF800000> : vector<8xf32>
    %7 = vector.multi_reduction <maximumf>, %5, %cst_6 [1] : vector<8x128xf32> to vector<8xf32>
    %8 = vector.shape_cast %7 : vector<8xf32> to vector<8x1xf32>
    %9 = arith.maximumf %6, %8 : vector<8x1xf32>
    %c0_7 = arith.constant 0 : index
    %c0_8 = arith.constant 0 : index
    %10 = vector.load %arg7[%c0_7, %c0_8] : memref<8x1xf32, #tpu.memory_space<vmem>>, vector<8x1xf32>
    %11 = arith.subf %6, %9 : vector<8x1xf32>
    %12 = math.exp %11 : vector<8x1xf32>
    %13 = arith.mulf %10, %12 : vector<8x1xf32>
    %14 = vector.broadcast %9 : vector<8x1xf32> to vector<8x128xf32>
    %15 = arith.subf %5, %14 : vector<8x128xf32>
    %16 = math.exp %15 : vector<8x128xf32>
    %cst_9 = arith.constant dense<0.000000e+00> : vector<8xf32>
    %17 = vector.multi_reduction <add>, %16, %cst_9 [1] : vector<8x128xf32> to vector<8xf32>
    %18 = vector.shape_cast %17 : vector<8xf32> to vector<8x1xf32>
    %19 = arith.addf %13, %18 : vector<8x1xf32>
    %c0_10 = arith.constant 0 : index
    %c0_11 = arith.constant 0 : index
    %20 = vector.load %arg7[%c0_10, %c0_11] : memref<8x1xf32, #tpu.memory_space<vmem>>, vector<8x1xf32>
    tpu.vector_store %arg7[%c0_10, %c0_11], %19 {strides = array<i32>} : memref<8x1xf32, #tpu.memory_space<vmem>>, vector<8x1xf32>,
    %c0_12 = arith.constant 0 : index
    %c0_13 = arith.constant 0 : index
    %21 = vector.load %arg6[%c0_12, %c0_13] : memref<8x1xf32, #tpu.memory_space<vmem>>, vector<8x1xf32>
    tpu.vector_store %arg6[%c0_12, %c0_13], %9 {strides = array<i32>} : memref<8x1xf32, #tpu.memory_space<vmem>>, vector<8x1xf32>,
    %c1_i32 = arith.constant 1 : i32
    %22 = arith.cmpi eq, %arg2, %c1_i32 : i32
    %23 = arith.extui %22 : i1 to i32
    %c0_i32_14 = arith.constant 0 : i32
    %24 = arith.cmpi ne, %23, %c0_i32_14 : i32
    scf.if %24 {
      %c0_15 = arith.constant 0 : index
      %c0_16 = arith.constant 0 : index
      %25 = vector.load %arg6[%c0_15, %c0_16] : memref<8x1xf32, #tpu.memory_space<vmem>>, vector<8x1xf32>
      %c0_17 = arith.constant 0 : index
      %c0_18 = arith.constant 0 : index
      %26 = vector.load %arg7[%c0_17, %c0_18] : memref<8x1xf32, #tpu.memory_space<vmem>>, vector<8x1xf32>
      %27 = math.log %26 : vector<8x1xf32>
      %28 = arith.addf %25, %27 : vector<8x1xf32>
      %29 = vector.shape_cast %28 : vector<8x1xf32> to vector<1x8x1xf32>
      %c0_19 = arith.constant 0 : index
      %c0_20 = arith.constant 0 : index
      %c0_21 = arith.constant 0 : index
      %30 = vector.load %arg5[%c0_19, %c0_20, %c0_21] : memref<1x8x1xf32, #tpu.memory_space<vmem>>, vector<1x8x1xf32>
      tpu.vector_store %arg5[%c0_19, %c0_20, %c0_21], %29 {strides = array<i32>} : memref<1x8x1xf32, #tpu.memory_space<vmem>>, vector<1x8x1xf32>,
    } else {
    }
    return
  }
  func.func @transform_0(%arg0: i32, %arg1: i32, %arg2: i32) -> (i32, i32) {
    %c0_i32 = arith.constant 0 : i32
    %c0_i32_0 = arith.constant 0 : i32
    return %arg0, %c0_i32 : i32, i32
  }
  func.func @transform_1(%arg0: i32, %arg1: i32, %arg2: i32) -> (i32, i32) {
    %c2_i32 = arith.constant 2 : i32
    %0 = arith.muli %arg1, %c2_i32 : i32
    %1 = arith.addi %0, %arg2 : i32
    %c0_i32 = arith.constant 0 : i32
    %c0_i32_0 = arith.constant 0 : i32
    return %1, %c0_i32 : i32, i32
  }
  func.func @transform_2(%arg0: i32, %arg1: i32, %arg2: i32) -> (i32, i32, i32) {
    %c0_i32 = arith.constant 0 : i32
    %c0_i32_0 = arith.constant 0 : i32
    return %arg1, %arg0, %c0_i32 : i32, i32, i32
  }
}

</mosaic_0001>

<bundles_post_ra>
// kernel: tpu_custom_call.1
= control target key start
LH: loop header
LB: loop body
LE: loop exit
PB: predicated region body
PF: predicated region fallthrough
CT: control target
= control target key end

     0   :  { %s829_s0 = inlined_call_operand.hbm [shape: f32[8,128], index: 0, kind: input, shape index: {}]   ;;  %s830_s1 = inlined_call_operand.hbm [shape: f32[512,128], index: 1, kind: input, shape index: {}]   ;;  %s831_s2 = inlined_call_operand.vmem [shape: f32[2,8,1], index: 2, kind: output, shape index: {}]  }
   0x1   :  { %833 = sst [smem:[#allocation11_spill]] %s829_s0 }
   0x2   :  { %7 = vsyncpa [#allocation5], 0 }
   0x3   :  { %8 = vsyncpa [#allocation7], 0 }
   0x4   :  { %10 = vsyncpa [#allocation7 + $0x1], 0  ;;  %s671_s9 = smov 0   ;;  %s673_s10 = smov 0  }
   0x5   :  { %s675_s11 = smov 0   ;;  %s677_s12 = smov 0  }
   0x6   :  { %s679_s13 = smov 0   ;;  %s681_s14 = smov 0  }
   0x7   :  { %s683_s15 = smov 0   ;;  %s685_s16 = smov 0  }
   0x8 LB: > { %834 = sst [smem:[#allocation10_spill]] %s644_s15  ;;  %s404_s17 = sadd.s32 4294967295, %s648_s16   ;;  %s648_s16 = sphi %s685_s16, %s16_s16   ;;  %s644_s15 = sphi %s683_s15, %s846_s15   ;;  %s640_s14 = sphi %s681_s14, %s845_s14   ;;  %s636_s13 = sphi %s679_s13, %s840_s13   ;;  %s632_s12 = sphi %s677_s12, %s844_s12   ;;  %s628_s11 = sphi %s675_s11, %s843_s11   ;;  %s624_s10 = sphi %s673_s10, %s842_s10   ;;  %s620_s9 = sphi %s671_s9, %s841_s9  }
   0x9   : > { %p79_p0 = scmp.ne.s32.totalorder %s628_s11, %s624_s10  ;;  %p80_p1 = scmp.eq.s32.totalorder %s648_s16, 0 }
   0xa   : > { %p85_p2 = scmp.ne.s32.totalorder %s624_s10, %s620_s9  ;;  %p714_p3 = scmp.eq.s32.totalorder %s404_s17, 0 }
   0xb   : > { %p408_p4 = scmp.ge.s32.totalorder %s648_s16, 1  ;;  %p81_p5 = por %p80_p1, %p79_p0 }
   0xc   : > { %p124_p6 = scmp.lt.s32.totalorder %s648_s16, 5  ;;  %p722_p7 = por %p714_p3, %p85_p2 }
   0xd   : > { %s838_s0 = sld [smem:[#allocation11_spill]]  ;;  %s650_s24 = smov [#allocation4]  }
   0xe   : > { %p726_p8 = pnand %p408_p4, %p124_p6  ;;  %s140_s25 = sshll.u32 %s650_s24, 4  ;;  %s141_s25 = int_to_ptr.vmem [resolvable:$true] %s140_s25 }
   0xf   : > { %p439_p11 = scmp.lt.s32.totalorder %s648_s16, 4  ;;  %s31_s27 = sadd.s32 1, %s644_s15 }
  0x10   : > { %p430_p9 = pneg %p726_p8  ;;  %s28_s28 = sadd.s32 1, %s640_s14 }
  0x11   : > { %p738_p12 = pnand %p439_p11, %p81_p5  ;;  %s406_s29 = sshll.u32 %s644_s15, 1 }
  0x12   : > { %p431_p10 = pnand %p430_p9, %p714_p3  ;;  %p29_p13 = scmp.ge.s32.totalorder %s28_s28, 2 }
  0x13   : > { %s138_s23 = sshll.u32 %s838_s0, 4  ;;  %s66_s30 = sadd.s32 %s640_s14, %s406_s29  ;;  %s139_s23 = int_to_ptr.hbm [resolvable:$true] %s138_s23 }
  0x14   : > { %433 = dma.hbm_to_vmem [thread:$0]  (!%p431_p10), %s139_s23, 128, %s141_s25, [#allocation5]  }
  0x15   : > { %s72_s3 = sadd.s32 1, %s628_s11  ;;  %s151_s4 = sand.u32 1, %s628_s11  }
  0x16   : > { %s848_s28 = smov (%p29_p13, %s28_s28), 0  ;;  %s850_s27 = smov (!%p29_p13, %s31_s27), %s644_s15 }
  0x17   : > { %s411_s5 = sshll.u32 %s151_s4, 7  ;;  %p33_p0 = scmp.ge.s32.totalorder %s850_s27, 2 }
  0x18   : > { %s423_s6 = sshll.u32 %s66_s30, 7  ;;  %s155_s7 = scalar_lea.vmem [#allocation6], %s411_s5 }
  0x19   : > { %s165_s8 = sshll.u32 %s155_s7, 4  ;;  %s852_s27 = smov (%p33_p0, %s850_s27), 0  ;;  %s166_s8 = int_to_ptr.vmem [resolvable:$true] %s165_s8 }
  0x1a   : > { %s162_s21 = scalar_lea.hbm %s830_s1, %s423_s6  ;;  %s407_s22 = sshll.u32 %s852_s27, 1 }
  0x1b   : > { %s163_s23 = sshll.u32 %s162_s21, 4  ;;  %s68_s24 = sadd.s32 %s407_s22, %s848_s28  ;;  %s164_s23 = int_to_ptr.hbm [resolvable:$true] %s163_s23 }
  0x1c   : > { %s69_s25 = ssub.s32 %s66_s30, %s68_s24  ;;  %s152_s29 = scalar_lea.sflag [#allocation7], %s151_s4 }
  0x1d   : > { %p70_p1 = scmp.eq.s32.totalorder %s69_s25, 0  ;;  %s651_s0 = smov 128  }
  0x1e   : > { %s652_s15 = smov 8   ;;  %177 = sbr.rel (%p726_p8) target bundleno = 622 (0x26e), region = 28 }
  0x1f   : > { %437 = dma.hbm_to_vmem [thread:$0]  (!%p738_p12), %s164_s23, 2048, %s166_s8, %s152_s29, %s651_s0, %s651_s0, %s652_s15  }
  0x20   : > { %s761_s5 = scalar_select %p70_p1, %s628_s11, %s72_s3  }
  0x23   : > { %611 = dma.done.wait (%p714_p3), [#allocation5], 128  }
  0x24   : > { %613 = vsyncadd (%p714_p3), [#allocation5], 4294967168  ;;  %s184_s30 = sand.u32 1, %s624_s10  }
  0x25   : > { %s417_s6 = sshll.u32 %s184_s30, 7  ;;  %s185_s4 = scalar_lea.sflag [#allocation7], %s184_s30 }
  0x26   : > { %s770_s7 = scalar_lea.vmem [#allocation6], %s417_s6 }
  0x27   : > { %615 = dma.done.wait (%p722_p7), %s185_s4, 2048  }
  0x28   : > { %617 = vsyncadd (%p722_p7), %s185_s4, 4294965248  ;;  %p215_p2 = scmp.lt.s32.totalorder %s636_s13, 1  ;;  %p419_p3 = scmp.ne.s32.totalorder %s632_s12, 0 }
  0x2a   : > { %s854_s13 = smov (!%p215_p2, %s636_s13), 1  ;;  %225 = sbr.rel (%p419_p3) target bundleno = 50 (0x32), region = 40 }
  0x2b   : > { %s418_s0 = sshll.u32 %s854_s13, 3 }
  0x2c   : > { %s781_s20 = scalar_lea.vmem %s831_s2, %s418_s0 }
  0x2f   : > { %vm226_vm0 = vcmask 7168   ;;  %v653_v0 = vmov -inf   ;;  %v654_v1 = vmov 0.0  }
  0x30   : > { %227 = vst.msk [vmem:[#allocation2] sm:$0xff] %vm226_vm0, %v653_v0 }
  0x31   : > { %228 = vst.msk [vmem:[#allocation3] sm:$0xff] %vm226_vm0, %v654_v1 }
  0x32 PF: > { %v245_v2 = vld [vmem:[%s770_s7 + $0x78] sm:$0xff]  ;;  %v244_v3 = vld [vmem:[%s770_s7 + $0x70] sm:$0xff]  ;;  %v243_v4 = vld [vmem:[%s770_s7 + $0x68] sm:$0xff]  ;;  %v655_v20 = vmov 0   ;;  %vm286_vm1 = vcmask 7168   ;;  %p420_p4 = scmp.ne.s32.totalorder %s632_s12, 1 }
  0x33   : > { %246 = vmatpush.xpose.msra.mxu0 %v245_v2  ;;  %v242_v5 = vld [vmem:[%s770_s7 + $0x60] sm:$0xff]  ;;  %v241_v6 = vld [vmem:[%s770_s7 + $0x58] sm:$0xff]  ;;  %v240_v7 = vld [vmem:[%s770_s7 + $0x50] sm:$0xff]  ;;  %511 = vset.pattern.permute.xlu0 %v655_v20 }
  0x34   : > { %v239_v8 = vld [vmem:[%s770_s7 + $0x48] sm:$0xff]  ;;  %v238_v9 = vld [vmem:[%s770_s7 + $0x40] sm:$0xff]  ;;  %v237_v10 = vld [vmem:[%s770_s7 + $0x38] sm:$0xff] }
  0x35   : > { %v236_v11 = vld [vmem:[%s770_s7 + $0x30] sm:$0xff]  ;;  %v235_v12 = vld [vmem:[%s770_s7 + $0x28] sm:$0xff]  ;;  %v234_v13 = vld [vmem:[%s770_s7 + $0x20] sm:$0xff] }
  0x36   : > { %v233_v14 = vld [vmem:[%s770_s7 + $0x18] sm:$0xff]  ;;  %v232_v15 = vld [vmem:[%s770_s7 + $0x10] sm:$0xff]  ;;  %v231_v16 = vld [vmem:[%s770_s7 + $0x8] sm:$0xff] }
  0x37   : > { %247 = vmatpush.xpose.msra.mxu0 %v244_v3  ;;  %v230_v17 = vld [vmem:[%s770_s7] sm:$0xff]  ;;  %v229_v18 = vld [vmem:[#allocation4] sm:$0xff]  ;;  %v266_v21 = vld [vmem:[#allocation2] sm:$0xff] }
  0x38   : > { %v270_v31 = vld [vmem:[#allocation3] sm:$0xff] }
  0x3b   : > { %248 = vmatpush.xpose.msra.mxu0 %v243_v4 }
  0x3f   : > { %249 = vmatpush.xpose.msra.mxu0 %v242_v5 }
  0x43   : > { %250 = vmatpush.xpose.msra.mxu0 %v241_v6 }
  0x47   : > { %251 = vmatpush.xpose.msra.mxu0 %v240_v7 }
  0x4b   : > { %252 = vmatpush.xpose.msra.mxu0 %v239_v8 }
  0x4f   : > { %253 = vmatpush.xpose.msra.mxu0 %v238_v9 }
  0x53   : > { %254 = vmatpush.xpose.msra.mxu0 %v237_v10 }
  0x57   : > { %255 = vmatpush.xpose.msra.mxu0 %v236_v11 }
  0x5b   : > { %256 = vmatpush.xpose.msra.mxu0 %v235_v12 }
  0x5f   : > { %257 = vmatpush.xpose.msra.mxu0 %v234_v13 }
  0x63   : > { %258 = vmatpush.xpose.msra.mxu0 %v233_v14 }
  0x67   : > { %259 = vmatpush.xpose.msra.mxu0 %v232_v15 }
  0x6b   : > { %260 = vmatpush.xpose.msra.mxu0 %v231_v16 }
  0x6f   : > { %261 = vmatpush.xpose.msra.mxu0 %v230_v17 }
  0x72   : > { %262 = vmatmul.f32.vlgmr.msra.gmra.mxu0 %v229_v18 }
  0xef   : > { %v263_v19 = vpop.f32.mrf.mxu0 }
  0xf0   : > { %267 = vmax.xlane.f32.xlu0 %v263_v19 }
 0x163   : > { %v268_v22 = vpop.xlane.xlu0 %267 }
 0x164   : > { %v269_v23 = vmax.f32 %v266_v21, %v268_v22 }
 0x166   : > { %v271_v24 = vsub.f32 %v266_v21, %v269_v23  ;;  %288 = vst.msk [vmem:[#allocation2] sm:$0xff] %vm286_vm1, %v269_v23  ;;  %277 = vperm.xlu0 %511, %v269_v23  }
 0x168   : > { %v272_v29 = vmul.f32 1.442695, %v271_v24 }
 0x1d8   : > { %v278_v25 = vpop.permute.xlu0 %277 }
 0x1d9   : > { %v280_v26 = vsub.f32 %v263_v19, %v278_v25 }
 0x1db   : > { %v281_v27 = vmul.f32 1.442695, %v280_v26 }
 0x1dd   : > { %512 = vpow2.f32 %v281_v27 }
 0x1de   : > { %514 = vpow2.f32 %v272_v29 }
 0x1e3   : > { %v513_v28 = vpop.eup %512 }
 0x1e4   : > { %283 = vadd.xlane.f32.xlu1 %v513_v28  ;;  %v515_v30 = vpop.eup %514 }
 0x1e5   : > { %v274_v32 = vmul.f32 %v515_v30, %v270_v31 }
 0x256   : > { %292 = sbr.rel (%p420_p4) target bundleno = 622 (0x26e), region = 44 }
 0x257   : > { %v284_v33 = vpop.xlane.xlu1 %283 }
 0x258   : > { %v285_v34 = vadd.f32 %v284_v33, %v274_v32 }
 0x25a   : > { %287 = vst.msk [vmem:[#allocation3] sm:$0xff] %vm286_vm1, %v285_v34 }
 0x25b   : > { %v293_v37 = vld [vmem:[#allocation2] sm:$0xff] }
 0x261   : > { %v294_v35 = vld [vmem:[#allocation3] sm:$0xff] }
 0x262   : > { %516 = vlog2.f32 %v294_v35 }
 0x268   : > { %v517_v36 = vpop.eup %516 }
 0x269   : > { %v296_v38 = vmul.f32 0.6931472, %v517_v36 }
 0x26b   : > { %v297_v39 = vadd.f32 %v296_v38, %v293_v37 }
 0x26d   : > { %298 = vst.msk [vmem:[%s781_s20] sm:$0xff] %vm286_vm1, %v297_v39 }
 0x26e PF: > { %s16_s16 = sadd.s32 1, %s648_s16   ;;  %s840_s13 = sld [smem:[#allocation10_spill]] }
 0x26f   : > { %p13_p5 = scmp.ge.s32.totalorder %s16_s16, 6   ;;  %s841_s9 = smov %s624_s10 }
 0x270   : > { %s842_s10 = smov %s628_s11  ;;  %s843_s11 = smov %s761_s5 }
 0x271   : > { %s844_s12 = smov %s640_s14  ;;  %s845_s14 = smov %s848_s28 }
 0x272   : > { %s846_s15 = smov %s852_s27  ;;  %15 = sbr.rel (!%p13_p5) target bundleno = 8 (0x8), region = 82 }
 0x277   :  { %324 = vsyncpa [#allocation5], 1 }
 0x278   :  { %326 = vsyncpa [#allocation5 + $0x1], 1 }
 0x279   :  { %327 = vsyncpa [#allocation7], 1 }
 0x27a   :  { %329 = vsyncpa [#allocation7 + $0x1], 1 }

</bundles_post_ra>
